<compile_context>
chip_gen: v6e
topology: v6e:2x2x1
jax: 0.10.0
libtpu: 0.0.40
codegen_flags: <defaults>
</compile_context>

<pallas_src>
import jax
import jax.numpy as jnp
from jax.experimental import pallas as pl
from jax.experimental.pallas import tpu as pltpu


def _focal_ce_kernel(x_ref, t_ref, o_ref, acc_ref):
    """Accumulates per-column cross-entropy; emits one partial sum per group."""
    i = pl.program_id(1)

    @pl.when(i == 0)
    def _():
        acc_ref[...] = jnp.zeros_like(acc_ref)

    x = x_ref[...].astype(jnp.float32)          # (C, TN) logits, f32 compute
    t = t_ref[...]                              # (1, TN) int32 targets
    c, tn = x.shape

    # Numerically stable per-column cross entropy (reductions over sublanes):
    #   ce_j = logsumexp(x[:, j]) - x[target_j, j]
    m = jnp.max(x, axis=0, keepdims=True)                                # (1, TN)
    lse = jnp.log(jnp.sum(jnp.exp(x - m), axis=0, keepdims=True)) + m    # (1, TN)

    classes = jax.lax.broadcasted_iota(jnp.int32, (c, tn), 0)            # (C, TN)
    tgt = jnp.sum(jnp.where(classes == t, x, 0.0), axis=0, keepdims=True)

    # Lane-wise partial sums: pure element-wise adds, no per-step XLU reduce.
    acc_ref[...] += lse - tgt                                            # (1, TN)

    @pl.when(i == pl.num_programs(1) - 1)
    def _():
        # Single deferred cross-lane reduce per group.
        o_ref[...] = jnp.sum(acc_ref[...], axis=-1, keepdims=True).reshape(1, 1, 1)


def _round_up(x, m):
    return ((x + m - 1) // m) * m


def focal_loss(logits, targets, gamma=0.0, block_cols=8192):
    """Pallas TPU implementation of FocalLoss.forward(input, target)."""
    n, c = logits.shape

    # Lane-tile size: multiple of 128, capped at block_cols.
    tn = min(int(block_cols), _round_up(n, 128))
    tn = max(128, (tn // 128) * 128)
    tiles = pl.cdiv(n, tn)

    # Leading "parallel" axis of 2 lets v7x megacore use both TensorCores;
    # it runs serially (and stays correct) on single-TC chips.
    n_groups = 2 if tiles >= 2 else 1
    tiles_per_group = pl.cdiv(tiles, n_groups)
    n_pad = n_groups * tiles_per_group * tn

    # classes-on-sublanes / batch-on-lanes layout; native dtype (cast in-kernel).
    xt = jnp.transpose(logits)                        # (C, N)
    tt = targets.astype(jnp.int32).reshape(1, n)      # (1, N)

    if n_pad > n:
        pad = n_pad - n
        # Padding columns contribute exactly zero cross entropy:
        # logit 0 at class 0 (the padded target), -1e30 everywhere else.
        pad_x = jnp.concatenate(
            [jnp.zeros((1, pad), xt.dtype),
             jnp.full((c - 1, pad), -1e30, xt.dtype)],
            axis=0)
        xt = jnp.concatenate([xt, pad_x], axis=1)
        tt = jnp.concatenate([tt, jnp.zeros((1, pad), jnp.int32)], axis=1)

    partials = pl.pallas_call(
        _focal_ce_kernel,
        out_shape=jax.ShapeDtypeStruct((n_groups, 1, 1), jnp.float32),
        grid_spec=pltpu.PrefetchScalarGridSpec(
            num_scalar_prefetch=0,
            grid=(n_groups, tiles_per_group),
            in_specs=[
                pl.BlockSpec((c, tn), lambda g, i: (0, g * tiles_per_group + i)),
                pl.BlockSpec((1, tn), lambda g, i: (0, g * tiles_per_group + i)),
            ],
            out_specs=pl.BlockSpec((1, 1, 1), lambda g, i: (g, 0, 0)),
            scratch_shapes=[pltpu.VMEM((1, tn), jnp.float32)],  # lane-wise ce sums
        ),
        compiler_params=pltpu.CompilerParams(
            dimension_semantics=("parallel", "arbitrary"),
            vmem_limit_bytes=32 * 1024 * 1024,
        ),
    )(xt, tt)

    # Combine per-group partial sums; focal transform on the scalar is trivial.
    logp = jnp.sum(partials) / n
    p = jnp.exp(-logp)
    return (1.0 - p) ** float(gamma) * logp


def _focal_loss_ref(logits, targets, gamma=0.0):
    """Pure-JAX reference (mirrors torch.nn.CrossEntropyLoss + focal term)."""
    logits = logits.astype(jnp.float32)
    logz = jax.nn.logsumexp(logits, axis=-1)
    tgt = jnp.take_along_axis(logits, targets[:, None], axis=-1)[:, 0]
    logp = jnp.mean(logz - tgt)
    p = jnp.exp(-logp)
    return (1.0 - p) ** gamma * logp


if __name__ == "__main__":
    ok = True

    # MNIST-style: small batch of 10-class logits (module default gamma=0,
    # also exercise the power path with gamma=2).
    key = jax.random.PRNGKey(0)
    k_x, k_t = jax.random.split(key)
    N, C = 8, 10
    logits = jax.random.normal(k_x, (N, C), dtype=jnp.float32)
    targets = jax.random.randint(k_t, (N,), 0, C, dtype=jnp.int32)
    for gamma in (0.0, 2.0):
        out = jax.block_until_ready(focal_loss(logits, targets, gamma=gamma))
        ref = _focal_loss_ref(logits, targets, gamma=gamma)
        ok &= bool(jnp.allclose(out, ref, rtol=1e-5, atol=1e-5))

    # Multi-tile + two-group path with wrapper padding (ragged batch):
    # exercises the accumulator, pl.when epilogue, parallel axis and the
    # zero-CE padding columns.
    k_x2, k_t2 = jax.random.split(jax.random.PRNGKey(1))
    N2, C2 = 300, 10
    logits2 = jax.random.normal(k_x2, (N2, C2), dtype=jnp.float32)
    targets2 = jax.random.randint(k_t2, (N2,), 0, C2, dtype=jnp.int32)
    out2 = jax.block_until_ready(
        focal_loss(logits2, targets2, gamma=2.0, block_cols=128))
    ref2 = _focal_loss_ref(logits2, targets2, gamma=2.0)
    ok &= bool(jnp.allclose(out2, ref2, rtol=1e-5, atol=1e-5))

    if ok:
        print("KERNEL_OK")
</pallas_src>

<mosaic_0001>
module attributes {stable_mosaic.version = 11 : i64} {
  func.func @_focal_ce_kernel(%arg0: i32, %arg1: i32, %arg2: memref<10x128xf32, #tpu.memory_space<vmem>>, %arg3: memref<1x128xi32, #tpu.memory_space<vmem>>, %arg4: memref<1x1x1xf32, #tpu.memory_space<vmem>>, %arg5: memref<1x128xf32, #tpu.memory_space<vmem>>) attributes {dimension_semantics = [#tpu.dimension_semantics<parallel>, #tpu.dimension_semantics<arbitrary>], iteration_bounds = array<i64: 1, 1>, scalar_prefetch = 0 : i64, scratch_operands = 1 : i64, tpu.core_type = #tpu.core_type<tc>, window_params = [{transform_indices = @transform_0, window_bounds = array<i64: 10, 128>}, {transform_indices = @transform_1, window_bounds = array<i64: 1, 128>}, {transform_indices = @transform_2, window_bounds = array<i64: 1, 1, 1>}]} {
    %c0_i32 = arith.constant 0 : i32
    %0 = arith.cmpi eq, %arg1, %c0_i32 : i32
    %1 = arith.extui %0 : i1 to i32
    %c0_i32_0 = arith.constant 0 : i32
    %2 = arith.cmpi ne, %1, %c0_i32_0 : i32
    scf.if %2 {
      %cst_13 = arith.constant 0.000000e+00 : f32
      %28 = vector.broadcast %cst_13 : f32 to vector<1x128xf32>
      %c0_14 = arith.constant 0 : index
      %c0_15 = arith.constant 0 : index
      %29 = vector.load %arg5[%c0_14, %c0_15] : memref<1x128xf32, #tpu.memory_space<vmem>>, vector<1x128xf32>
      tpu.vector_store %arg5[%c0_14, %c0_15], %28 {strides = array<i32>} : memref<1x128xf32, #tpu.memory_space<vmem>>, vector<1x128xf32>,
    } else {
    }
    %c0 = arith.constant 0 : index
    %c0_1 = arith.constant 0 : index
    %3 = vector.load %arg2[%c0, %c0_1] : memref<10x128xf32, #tpu.memory_space<vmem>>, vector<10x128xf32>
    %c0_2 = arith.constant 0 : index
    %c0_3 = arith.constant 0 : index
    %4 = vector.load %arg3[%c0_2, %c0_3] : memref<1x128xi32, #tpu.memory_space<vmem>>, vector<1x128xi32>
    %cst = arith.constant dense<0xFF800000> : vector<128xf32>
    %5 = vector.multi_reduction <maximumf>, %3, %cst [0] : vector<10x128xf32> to vector<128xf32>
    %6 = vector.shape_cast %5 : vector<128xf32> to vector<1x128xf32>
    %7 = vector.broadcast %6 : vector<1x128xf32> to vector<10x128xf32>
    %8 = arith.subf %3, %7 : vector<10x128xf32>
    %9 = math.exp %8 : vector<10x128xf32>
    %cst_4 = arith.constant dense<0.000000e+00> : vector<128xf32>
    %10 = vector.multi_reduction <add>, %9, %cst_4 [0] : vector<10x128xf32> to vector<128xf32>
    %11 = vector.shape_cast %10 : vector<128xf32> to vector<1x128xf32>
    %12 = math.log %11 : vector<1x128xf32>
    %13 = arith.addf %12, %6 : vector<1x128xf32>
    %14 = tpu.iota {dimensions = array<i32: 0>} : vector<10x128xi32>
    %15 = vector.broadcast %4 : vector<1x128xi32> to vector<10x128xi32>
    %16 = arith.cmpi eq, %14, %15 : vector<10x128xi32>
    %cst_5 = arith.constant 0.000000e+00 : f32
    %17 = vector.broadcast %cst_5 : f32 to vector<10x128xf32>
    %18 = arith.select %16, %3, %17 : vector<10x128xi1>, vector<10x128xf32>
    %cst_6 = arith.constant dense<0.000000e+00> : vector<128xf32>
    %19 = vector.multi_reduction <add>, %18, %cst_6 [0] : vector<10x128xf32> to vector<128xf32>
    %20 = vector.shape_cast %19 : vector<128xf32> to vector<1x128xf32>
    %c0_7 = arith.constant 0 : index
    %c0_8 = arith.constant 0 : index
    %21 = vector.load %arg5[%c0_7, %c0_8] : memref<1x128xf32, #tpu.memory_space<vmem>>, vector<1x128xf32>
    %22 = arith.subf %13, %20 : vector<1x128xf32>
    %23 = arith.addf %21, %22 : vector<1x128xf32>
    %c0_9 = arith.constant 0 : index
    %c0_10 = arith.constant 0 : index
    %24 = vector.load %arg5[%c0_9, %c0_10] : memref<1x128xf32, #tpu.memory_space<vmem>>, vector<1x128xf32>
    tpu.vector_store %arg5[%c0_9, %c0_10], %23 {strides = array<i32>} : memref<1x128xf32, #tpu.memory_space<vmem>>, vector<1x128xf32>,
    %c0_i32_11 = arith.constant 0 : i32
    %25 = arith.cmpi eq, %arg1, %c0_i32_11 : i32
    %26 = arith.extui %25 : i1 to i32
    %c0_i32_12 = arith.constant 0 : i32
    %27 = arith.cmpi ne, %26, %c0_i32_12 : i32
    scf.if %27 {
      %c0_13 = arith.constant 0 : index
      %c0_14 = arith.constant 0 : index
      %28 = vector.load %arg5[%c0_13, %c0_14] : memref<1x128xf32, #tpu.memory_space<vmem>>, vector<1x128xf32>
      %cst_15 = arith.constant dense<0.000000e+00> : vector<1xf32>
      %29 = vector.multi_reduction <add>, %28, %cst_15 [1] : vector<1x128xf32> to vector<1xf32>
      %30 = vector.shape_cast %29 : vector<1xf32> to vector<1x1xf32>
      %31 = vector.shape_cast %30 : vector<1x1xf32> to vector<1x1x1xf32>
      %c0_16 = arith.constant 0 : index
      %c0_17 = arith.constant 0 : index
      %c0_18 = arith.constant 0 : index
      %32 = vector.load %arg4[%c0_16, %c0_17, %c0_18] : memref<1x1x1xf32, #tpu.memory_space<vmem>>, vector<1x1x1xf32>
      tpu.vector_store %arg4[%c0_16, %c0_17, %c0_18], %31 {strides = array<i32>} : memref<1x1x1xf32, #tpu.memory_space<vmem>>, vector<1x1x1xf32>,
    } else {
    }
    return
  }
  func.func @transform_0(%arg0: i32, %arg1: i32) -> (i32, i32) {
    %c1_i32 = arith.constant 1 : i32
    %0 = arith.muli %arg0, %c1_i32 : i32
    %1 = arith.addi %0, %arg1 : i32
    %c0_i32 = arith.constant 0 : i32
    %c0_i32_0 = arith.constant 0 : i32
    return %c0_i32, %1 : i32, i32
  }
  func.func @transform_1(%arg0: i32, %arg1: i32) -> (i32, i32) {
    %c1_i32 = arith.constant 1 : i32
    %0 = arith.muli %arg0, %c1_i32 : i32
    %1 = arith.addi %0, %arg1 : i32
    %c0_i32 = arith.constant 0 : i32
    %c0_i32_0 = arith.constant 0 : i32
    return %c0_i32, %1 : i32, i32
  }
  func.func @transform_2(%arg0: i32, %arg1: i32) -> (i32, i32, i32) {
    %c0_i32 = arith.constant 0 : i32
    %c0_i32_0 = arith.constant 0 : i32
    %c0_i32_1 = arith.constant 0 : i32
    return %arg0, %c0_i32, %c0_i32_0 : i32, i32, i32
  }
}

</mosaic_0001>

<bundles_post_ra>
// kernel: tpu_custom_call.1
= control target key start
LH: loop header
LB: loop body
LE: loop exit
PB: predicated region body
PF: predicated region fallthrough
CT: control target
= control target key end

     0   :  { %7 = vsyncpa [#allocation4], 0  ;;  %s217_s0 = inlined_call_operand.hbm [shape: f32[10,128], index: 0, kind: input, shape index: {}]   ;;  %s218_s1 = inlined_call_operand.vmem [shape: s32[1,128], index: 1, kind: input, shape index: {}]   ;;  %s219_s2 = inlined_call_operand.hbm [shape: f32[1,1,1], index: 2, kind: output, shape index: {}]  }
   0x1   :  { %8 = vsyncpa [#allocation5], 0  ;;  %s185_s9 = smov [#allocation3]  }
   0x2   :  { %s17_s10 = sshll.u32 %s185_s9, 4  ;;  %s18_s10 = int_to_ptr.vmem [resolvable:$true] %s17_s10 }
   0x3   :  { %s149_s11 = scalar_lea.vmem %s18_s10, 256  ;;  %p154_p1 = scmp.lt.s32.totalorder %s18_s10, %s18_s10 }
   0x4   :  { %p150_p0 = scmp.ne.s32.totalorder %s18_s10, %s149_s11  ;;  %p155_p2 = scmp.lt.s32.totalorder %s149_s11, %s149_s11 }
   0x6   :  { %p156_p3 = por %p155_p2, %p154_p1 }
   0x8   :  { %p157_p4 = pnand %p156_p3, %p150_p0 }
   0xa   :  { %160 = shalt.err (!%p157_p4)
}
   0xb   :  { %s186_s12 = smov 128   ;;  %s187_s13 = smov 8  }
   0xc   :  { %23 = dma.hbm_to_vmem [thread:$0]  %s217_s0, 256, %s18_s10, [#allocation4], %s186_s12, %s186_s12, %s187_s13  }
   0xd   :  { %181 = dma.done.wait [#allocation4], 256  }
   0xe   :  { %182 = vsyncadd [#allocation4], 4294967040  ;;  %v188_v0 = vmov 0.0   ;;  %vm52_vm0 = vcmask 1041408   ;;  %v49_v1 = vld [vmem:[#allocation3] sm:$0xff]  ;;  %v78_v15 = vlaneseq  ;;  %vm105_vm3 = vcmask 1040384  }
   0xf   :  { %48 = vst [vmem:[#allocation2] sm:$0x1] %v188_v0  ;;  %v50_v2 = vld [vmem:[#allocation3 + $0x8] sm:$0x3]  ;;  %v129_v18 = vld [vmem:[%s218_s1] ss:$0 sm:$0xff] }
  0x10   :  { %v53_v3 = vsel %vm52_vm0, %v50_v2, -inf  ;;  %v79_v16 = vshrl.u32 %v78_v15, 7  ;;  %s189_s1 = smov [#allocation6]   ;;  %vm109_vm4 = vcmask 0  }
  0x11   :  { %v54_v4 = vmax.f32 %v49_v1, %v53_v3  ;;  %s117_s17 = sshll.u32 %s189_s1, 4  ;;  %s118_s17 = int_to_ptr.vmem [resolvable:$true] %s117_s17 }
  0x12   :  { %v80_v17 = vadd.s32 8, %v79_v16  ;;  %vm85_vm2 = vcmp.eq.s32.totalorder %v79_v16, %v129_v18  ;;  %s161_s18 = scalar_lea.vmem %s118_s17, 16  ;;  %s165_s19 = scalar_lea.vmem %s118_s17, 32 }
  0x13   :  { %v55_v5 = vrot.slane %v54_v4, 4  ;;  %v87_v24 = vsel %vm85_vm2, %v49_v1, 0.0  ;;  %p162_p5 = scmp.ne.s32.totalorder %s118_s17, %s161_s18  ;;  %p166_p6 = scmp.lt.s32.totalorder %s118_s17, %s118_s17 }
  0x14   :  { %vm86_vm1 = vcmp.eq.s32.totalorder %v80_v17, %v129_v18  ;;  %p167_p7 = scmp.lt.s32.totalorder %s165_s19, %s161_s18 }
  0x15   :  { %v56_v6 = vmax.f32 %v54_v4, %v55_v5  ;;  %v88_v21 = vsel %vm86_vm1, %v50_v2, 0.0 }
  0x16   :  { %v89_v25 = vsel %vm52_vm0, %v88_v21, 0.0  ;;  %v97_v42 = vld [vmem:[#allocation2] sm:$0x1]  ;;  %p168_p8 = por %p167_p7, %p166_p6 }
  0x17   :  { %v57_v7 = vrot.slane %v56_v6, 2  ;;  %v90_v28 = vadd.f32 %v89_v25, %v87_v24 }
  0x18   :  { %p169_p9 = pnand %p168_p8, %p162_p5 }
  0x19   :  { %v58_v8 = vmax.f32 %v56_v6, %v57_v7  ;;  %v91_v31 = vrot.slane %v90_v28, 4 }
  0x1b   :  { %v59_v9 = vrot.slane %v58_v8, 1  ;;  %v92_v34 = vadd.f32 %v91_v31, %v90_v28 }
  0x1d   :  { %v60_v10 = vmax.f32 %v58_v8, %v59_v9  ;;  %v93_v35 = vrot.slane %v92_v34, 2 }
  0x1f   :  { %v61_v11 = vsub.f32 %v49_v1, %v60_v10  ;;  %v62_v12 = vsub.f32 %v50_v2, %v60_v10  ;;  %v94_v36 = vadd.f32 %v93_v35, %v92_v34 }
  0x21   :  { %v63_v13 = vmul.f32 1.442695, %v61_v11  ;;  %v65_v14 = vmul.f32 1.442695, %v62_v12  ;;  %v95_v37 = vrot.slane %v94_v36, 1 }
  0x23   :  { %135 = vpow2.f32 %v63_v13  ;;  %v96_v40 = vadd.f32 %v95_v37, %v94_v36 }
  0x24   :  { %137 = vpow2.f32 %v65_v14 }
  0x30   :  { %v136_v19 = vpop.eup %135 }
  0x31   :  { %v138_v20 = vpop.eup %137 }
  0x32   :  { %v67_v22 = vsel %vm52_vm0, %v138_v20, 0.0 }
  0x33   :  { %v68_v23 = vadd.f32 %v136_v19, %v67_v22 }
  0x35   :  { %v69_v26 = vrot.slane %v68_v23, 4 }
  0x37   :  { %v70_v27 = vadd.f32 %v69_v26, %v68_v23 }
  0x39   :  { %v71_v29 = vrot.slane %v70_v27, 2 }
  0x3b   :  { %v72_v30 = vadd.f32 %v71_v29, %v70_v27 }
  0x3d   :  { %v73_v32 = vrot.slane %v72_v30, 1 }
  0x3f   :  { %v74_v33 = vadd.f32 %v73_v32, %v72_v30 }
  0x41   :  { %139 = vlog2.f32 %v74_v33 }
  0x4e   :  { %v140_v38 = vpop.eup %139 }
  0x4f   :  { %v76_v39 = vmul.f32 0.6931472, %v140_v38 }
  0x51   :  { %v77_v41 = vadd.f32 %v76_v39, %v60_v10 }
  0x53   :  { %v98_v43 = vsub.f32 %v77_v41, %v96_v40 }
  0x55   :  { %v99_v44 = vadd.f32 %v98_v43, %v97_v42 }
  0x57   :  { %100 = vst [vmem:[#allocation2] sm:$0x1] %v99_v44 }
  0x5e   :  { %v104_v45 = vld [vmem:[#allocation2] sm:$0x1] }
  0x5f   :  { %v106_v46 = vsel %vm105_vm3, %v104_v45, 0.0 }
  0x60   :  { %107 = vadd.xlane.f32.xlu0 %v106_v46 }
  0xe9   :  { %v108_v47 = vpop.xlane.xlu0 %107 }
  0xea   :  { %110 = vst.msk [vmem:[#allocation6] sm:$0x1] %vm109_vm4, %v108_v47 }
  0xeb   :  { %172 = shalt.err (!%p169_p9)
}
  0xec   :  { %120 = dma.vmem_to_hbm [thread:$0]  %s118_s17, 16, %s219_s2, [#allocation5]  }
  0xed   :  { %183 = dma.done.wait [#allocation5], 16  }
  0xee   :  { %184 = vsyncadd [#allocation5], 4294967280 }
  0xef   :  { %124 = vsyncpa [#allocation4], 1 }
  0xf0   :  { %125 = vsyncpa [#allocation5], 1 }

</bundles_post_ra>
